<compile_context>
chip_gen: v6e
topology: v6e:2x2x1
jax: 0.10.0
libtpu: 0.0.40
codegen_flags: <defaults>
</compile_context>

<pallas_src>
import functools

import jax
import jax.numpy as jnp
import numpy as np
from jax.experimental import pallas as pl
from jax.experimental.pallas import tpu as pltpu


def _layer_norm_kernel(ab_ref, x_ref, out_ref, *, eps):
    # ab_ref: SMEM (2,) f32 = [alpha, bias]
    # x_ref / out_ref: (TR, D) VMEM tiles
    x = x_ref[...].astype(jnp.float32)                         # [TR, D]
    d = x.shape[-1]

    # Two-pass (centered) statistics -> numerically robust (review concern).
    mean = jnp.sum(x, axis=-1, keepdims=True) * (1.0 / d)      # [TR, 1]
    xc = x - mean
    var = jnp.sum(xc * xc, axis=-1, keepdims=True) * (1.0 / (d - 1))  # Bessel
    std = jnp.sqrt(var)

    inv = pl.reciprocal(std + eps, approx=False)               # EUP, exact
    y = ab_ref[0] * (xc * inv) + ab_ref[1]
    out_ref[...] = y.astype(out_ref.dtype)


def _pick_row_tile(n_rows, d, *, itemsize=4, max_tile_bytes=2 << 20):
    """Largest sublane-aligned row tile that divides n_rows and fits VMEM,
    while leaving >= 2 grid programs when the shape allows it (megacore)."""
    if n_rows <= 8 or n_rows % 8 != 0:
        # Block must either be a multiple of 8 rows or span the full dim.
        return n_rows
    cap = max(8, (max_tile_bytes // max(d * itemsize, 1)) // 8 * 8)
    cap = min(cap, n_rows, 4096)
    best = 8
    tr = 8
    while tr <= cap:
        if n_rows % tr == 0:
            best = tr
        tr += 8
    # Prefer >= 2 grid programs so both v7x TensorCores get work.
    if n_rows // best < 2:
        for tr2 in range(best - 8, 7, -8):
            if n_rows % tr2 == 0:
                if n_rows // tr2 >= 2:
                    best = tr2
                break
    return best


def layer_normalization(x, alpha, bias, *, eps=1e-12, row_tile=None):
    """Pallas LayerNormalization.forward.  x: [..., D]; alpha/bias: scalars."""
    orig_shape = x.shape
    d = orig_shape[-1]
    n = int(np.prod(orig_shape[:-1])) if len(orig_shape) > 1 else 1
    x2 = x.reshape(n, d)

    if row_tile is None:
        row_tile = _pick_row_tile(n, d, itemsize=x2.dtype.itemsize)
    assert n % row_tile == 0, "row_tile must divide the number of rows"
    n_rt = n // row_tile

    ab = jnp.array([alpha, bias], dtype=jnp.float32)

    cost = pl.CostEstimate(
        flops=7 * n * d,
        transcendentals=2 * n,                                  # sqrt + rcp per row
        bytes_accessed=2 * n * d * x2.dtype.itemsize + 8)

    out = pl.pallas_call(
        functools.partial(_layer_norm_kernel, eps=eps),
        out_shape=jax.ShapeDtypeStruct((n, d), x2.dtype),
        grid=(n_rt,),
        in_specs=[
            pl.BlockSpec(memory_space=pltpu.MemorySpace.SMEM),  # [alpha, bias]
            pl.BlockSpec((row_tile, d), lambda r: (r, 0)),      # x row tile
        ],
        out_specs=pl.BlockSpec((row_tile, d), lambda r: (r, 0)),
        compiler_params=pltpu.CompilerParams(
            dimension_semantics=("parallel",),
            vmem_limit_bytes=32 * 1024 * 1024),
        cost_estimate=cost,
    )(ab, x2)
    return out.reshape(orig_shape)


def reference(x, alpha, bias, eps=1e-12):
    """Pure-JAX replica of the PyTorch forward (torch.std -> Bessel, n-1)."""
    mean = x.mean(-1, keepdims=True)
    var = ((x - mean) ** 2).sum(-1, keepdims=True) / (x.shape[-1] - 1)
    std = jnp.sqrt(var)
    return alpha * (x - mean) / (std + eps) + bias


if __name__ == "__main__":
    # Small, (8,128)-aligned shapes: lane-dense stores, no masked partial vregs.
    B, S, D = 2, 64, 128

    key = jax.random.PRNGKey(0)
    x = jax.random.normal(key, (B, S, D), jnp.float32) * 2.0 + 0.5

    # alpha/bias are learnable scalars (init: 1.0 / 0.0); use non-trivial
    # deterministic values so their handling is actually exercised.
    alpha, bias = 0.75, 0.1

    out = layer_normalization(x, alpha, bias)
    out = jax.block_until_ready(out)

    out_ref = jax.block_until_ready(reference(x, alpha, bias))
    assert out.shape == (B, S, D)
    np.testing.assert_allclose(np.asarray(out), np.asarray(out_ref),
                               atol=1e-5, rtol=1e-5)

    print("KERNEL_OK")
</pallas_src>

<mosaic_0001>
module attributes {stable_mosaic.version = 11 : i64} {
  func.func @_layer_norm_kernel(%arg0: i32, %arg1: memref<2xf32, #tpu.memory_space<smem>>, %arg2: memref<64x128xf32, #tpu.memory_space<vmem>>, %arg3: memref<64x128xf32, #tpu.memory_space<vmem>>) attributes {dimension_semantics = [#tpu.dimension_semantics<parallel>], iteration_bounds = array<i64: 2>, scalar_prefetch = 0 : i64, scratch_operands = 0 : i64, tpu.core_type = #tpu.core_type<tc>, window_params = [{transform_indices = @transform_0, window_bounds = array<i64: 2>}, {transform_indices = @transform_1, window_bounds = array<i64: 64, 128>}, {transform_indices = @transform_2, window_bounds = array<i64: 64, 128>}]} {
    %c0 = arith.constant 0 : index
    %c0_0 = arith.constant 0 : index
    %0 = vector.load %arg2[%c0, %c0_0] : memref<64x128xf32, #tpu.memory_space<vmem>>, vector<64x128xf32>
    %cst = arith.constant dense<0.000000e+00> : vector<64xf32>
    %1 = vector.multi_reduction <add>, %0, %cst [1] : vector<64x128xf32> to vector<64xf32>
    %2 = vector.shape_cast %1 : vector<64xf32> to vector<64x1xf32>
    %cst_1 = arith.constant 7.812500e-03 : f32
    %3 = vector.broadcast %cst_1 : f32 to vector<64x1xf32>
    %4 = arith.mulf %2, %3 : vector<64x1xf32>
    %5 = vector.broadcast %4 : vector<64x1xf32> to vector<64x128xf32>
    %6 = arith.subf %0, %5 : vector<64x128xf32>
    %7 = arith.mulf %6, %6 : vector<64x128xf32>
    %cst_2 = arith.constant dense<0.000000e+00> : vector<64xf32>
    %8 = vector.multi_reduction <add>, %7, %cst_2 [1] : vector<64x128xf32> to vector<64xf32>
    %9 = vector.shape_cast %8 : vector<64xf32> to vector<64x1xf32>
    %cst_3 = arith.constant 0.00787401571 : f32
    %10 = vector.broadcast %cst_3 : f32 to vector<64x1xf32>
    %11 = arith.mulf %9, %10 : vector<64x1xf32>
    %12 = math.sqrt %11 : vector<64x1xf32>
    %cst_4 = arith.constant 9.99999996E-13 : f32
    %13 = vector.broadcast %cst_4 : f32 to vector<64x1xf32>
    %14 = arith.addf %12, %13 : vector<64x1xf32>
    %15 = tpu.reciprocal %14 : vector<64x1xf32> -> vector<64x1xf32>
    %c0_5 = arith.constant 0 : index
    %16 = memref.load %arg1[%c0_5] : memref<2xf32, #tpu.memory_space<smem>>
    %17 = vector.broadcast %15 : vector<64x1xf32> to vector<64x128xf32>
    %18 = arith.mulf %6, %17 : vector<64x128xf32>
    %19 = vector.broadcast %16 : f32 to vector<64x128xf32>
    %20 = arith.mulf %19, %18 : vector<64x128xf32>
    %c1 = arith.constant 1 : index
    %21 = memref.load %arg1[%c1] : memref<2xf32, #tpu.memory_space<smem>>
    %22 = vector.broadcast %21 : f32 to vector<64x128xf32>
    %23 = arith.addf %20, %22 : vector<64x128xf32>
    %c0_6 = arith.constant 0 : index
    %c0_7 = arith.constant 0 : index
    %24 = vector.load %arg3[%c0_6, %c0_7] : memref<64x128xf32, #tpu.memory_space<vmem>>, vector<64x128xf32>
    tpu.vector_store %arg3[%c0_6, %c0_7], %23 {strides = array<i32>} : memref<64x128xf32, #tpu.memory_space<vmem>>, vector<64x128xf32>,
    return
  }
  func.func @transform_0(%arg0: i32) -> i32 {
    %c0_i32 = arith.constant 0 : i32
    %c0_i32_0 = arith.constant 0 : i32
    return %c0_i32 : i32
  }
  func.func @transform_1(%arg0: i32) -> (i32, i32) {
    %c0_i32 = arith.constant 0 : i32
    %c0_i32_0 = arith.constant 0 : i32
    return %arg0, %c0_i32 : i32, i32
  }
  func.func @transform_2(%arg0: i32) -> (i32, i32) {
    %c0_i32 = arith.constant 0 : i32
    %c0_i32_0 = arith.constant 0 : i32
    return %arg0, %c0_i32 : i32, i32
  }
}

</mosaic_0001>

<bundles_post_ra>
// kernel: tpu_custom_call.1
= control target key start
LH: loop header
LB: loop body
LE: loop exit
PB: predicated region body
PF: predicated region fallthrough
CT: control target
= control target key end

     0   :  { %7 = vsyncpa [#allocation5], 0  ;;  %s953_s0 = inlined_call_operand.hbm [shape: f32[2], index: 0, kind: input, shape index: {}]   ;;  %s954_s1 = inlined_call_operand.hbm [shape: f32[128,128], index: 1, kind: input, shape index: {}]   ;;  %s955_s2 = inlined_call_operand.hbm [shape: f32[128,128], index: 2, kind: output, shape index: {}]  }
   0x1   :  { %8 = vsyncpa [#allocation3], 0 }
   0x2   :  { %10 = vsyncpa [#allocation3 + $0x1], 0 }
   0x3   :  { %11 = vsyncpa [#allocation4], 0 }
   0x4   :  { %13 = vsyncpa [#allocation4 + $0x1], 0  ;;  %s698_s9 = smov 0   ;;  %s700_s10 = smov 0  }
   0x5   :  { %s702_s11 = smov 0   ;;  %s704_s12 = smov 0  }
   0x6 LB: > { %s719_s13 = sadd.s32 4294967295, %s674_s12   ;;  %s455_s14 = sadd.s32 4294967294, %s674_s12   ;;  %s674_s12 = sphi %s704_s12, %s977_s12   ;;  %s670_s11 = sphi %s702_s11, %s976_s11   ;;  %s666_s10 = sphi %s700_s10, %s975_s10   ;;  %s662_s9 = sphi %s698_s9, %s974_s9  }
   0x7   : > { %s723_s15 = sadd.s32 1, %s674_s12   ;;  %s47_s16 = sadd.s32 1, %s670_s11 }
   0x8   : > { %s44_s17 = ssub.s32 %s674_s12, %s723_s15  ;;  %p54_p0 = scmp.ne.s32.totalorder %s670_s11, %s666_s10 }
   0x9   : > { %p45_p1 = scmp.eq.s32.totalorder %s44_s17, 0  ;;  %p55_p2 = scmp.eq.s32.totalorder %s674_s12, 0 }
   0xa   : > { %p60_p3 = scmp.ne.s32.totalorder %s666_s10, %s662_s9  ;;  %p956_p4 = scmp.eq.s32.totalorder %s719_s13, 0 }
   0xb   : > { %s735_s18 = scalar_select %p45_p1, %s670_s11, %s47_s16  }
   0xc   : > { %p737_p5 = por %p55_p2, %p54_p0  ;;  %p743_p6 = por %p956_p4, %p60_p3 }
   0xd   : > { %p84_p7 = scmp.eq.s32.totalorder %s719_s13, 1  ;;  %p90_p8 = scmp.eq.s32.totalorder %s455_s14, 1 }
   0xe   : > { %s961_s20 = scalar_select %p743_p6, 1, 0 }
   0xf   : > { %p456_p9 = scmp.ge.s32.totalorder %s674_s12, 1  ;;  %p97_p10 = scmp.lt.s32.totalorder %s674_s12, 3 }
  0x10   : > { %p750_p11 = por %p84_p7, %p54_p0  ;;  %p754_p12 = por %p90_p8, %p60_p3 }
  0x11   : > { %p758_p13 = pnand %p456_p9, %p97_p10  ;;  %p495_p4 = scmp.lt.s32.totalorder %s674_s12, 2 }
  0x12   : > { %s962_s21 = scalar_select %p750_p11, 1, 0 }
  0x13   : > { %s963_s22 = scalar_select %p754_p12, 1, 0 }
  0x14   : > { %s964_s23 = scalar_select %p758_p13, 1, 0 }
  0x15   : > { %p482_p2 = pneg %p758_p13  ;;  %s119_s24 = sand.u32 1, %s670_s11  }
  0x16   : > { %s472_s25 = sshll.u32 %s674_s12, 10  ;;  %p965_p6 = scmp.eq.s32.totalorder %s719_s13, 0 }
  0x17   : > { %p772_p7 = pnand %p495_p4, %p737_p5  ;;  %s459_s27 = sshll.u32 %s119_s24, 6 }
  0x18   : > { %p483_p0 = pnand %p482_p2, %p965_p6  ;;  %s676_s28 = smov [#allocation2]  }
  0x19   : > { %s782_s5 = scalar_lea.hbm %s954_s1, %s472_s25  ;;  %s123_s6 = scalar_lea.vmem [#allocation6], %s459_s27 }
  0x1a   : > { %485 = dma.hbm_to_smem (!%p483_p0), %s953_s0, 16, %s676_s28, [#allocation5]  }
  0x1b   : > { %s130_s7 = sshll.u32 %s123_s6, 4  ;;  %s786_s8 = scalar_lea.sflag [#allocation3], %s119_s24  ;;  %s784_s7 = int_to_ptr.vmem [resolvable:$true] %s130_s7 }
  0x1c   : > { %s578_s14 = scalar_lea.hbm %s782_s5, 1024  ;;  %p580_p4 = pneg %p772_p7 }
  0x1d   : > { %p579_p3 = scmp.ne.s32.totalorder %s782_s5, %s578_s14  ;;  %s583_s19 = scalar_lea.hbm %s954_s1, 2048 }
  0x1e   : > { %p584_p8 = scmp.lt.s32.totalorder %s782_s5, %s954_s1  ;;  %p585_p9 = scmp.lt.s32.totalorder %s583_s19, %s578_s14 }
  0x1f   : > { %p581_p5 = pnand %p580_p4, %p579_p3 }
  0x20   : > { %p586_p10 = por %p585_p9, %p584_p8 }
  0x21   : > { %p582_p6 = pneg %p581_p5 }
  0x23   : > { %p587_p2 = pnand %p586_p10, %p582_p6 }
  0x25   : > { %590 = shalt.err (!%p587_p2)
}
  0x26   : > { %s591_s24 = scalar_lea.vmem %s784_s7, 1024  ;;  %s677_s27 = smov [#allocation6]  }
  0x27   : > { %p592_p0 = scmp.ne.s32.totalorder %s784_s7, %s591_s24  ;;  %s596_s29 = sshll.u32 %s677_s27, 4  ;;  %s597_s29 = int_to_ptr.vmem [resolvable:$false] %s596_s29 }
  0x28   : > { %s598_s30 = scalar_lea.vmem %s597_s29, 2048  ;;  %p599_p5 = scmp.lt.s32.totalorder %s784_s7, %s597_s29 }
  0x29   : > { %p594_p1 = pnand %p592_p0, %p580_p4  ;;  %p600_p12 = scmp.lt.s32.totalorder %s598_s30, %s591_s24 }
  0x2b   : > { %p595_p3 = pneg %p594_p1  ;;  %p601_p11 = por %p600_p12, %p599_p5 }
  0x2d   : > { %p602_p13 = pnand %p601_p11, %p595_p3 }
  0x2f   : > { %605 = shalt.err (!%p602_p13)
}
  0x30   : > { %s678_s3 = smov 128   ;;  %s679_s4 = smov 8  }
  0x31   : > { %489 = dma.hbm_to_vmem [thread:$0]  (!%p772_p7), %s782_s5, 1024, %s784_s7, %s786_s8, %s678_s3, %s678_s3, %s679_s4  }
  0x32   : > { %p967_p4 = scmp.ne.s32.totalorder %s964_s23, 0 }
  0x33   : > { %p968_p1 = scmp.eq.s32.totalorder (!%p967_p4), %s719_s13, 0 }
  0x34   : > { %142 = sbr.rel (%p967_p4) target bundleno = 419 (0x1a3), region = 28 }
  0x39   : > { %649 = dma.done.wait (%p968_p1), [#allocation5], 16   ;;  %p969_p6 = pmov %p968_p1 }
  0x3a   : > { %s814_s6 = sand.u32 1, %s666_s10   ;;  %p970_p11 = scmp.ne.s32.totalorder %s961_s20, 0 }
  0x3b   : > { %651 = vsyncadd (%p969_p6), [#allocation5], 4294967280  ;;  %s464_s14 = sshll.u32 %s814_s6, 6  ;;  %s149_s16 = scalar_lea.sflag [#allocation3], %s814_s6 }
  0x3c   : > { %s152_s26 = scalar_lea.vmem [#allocation6], %s464_s14 }
  0x3d   : > { %653 = dma.done.wait (%p970_p11), %s149_s16, 1024  }
  0x3e   : > { %655 = vsyncadd (%p970_p11), %s149_s16, 4294966272 }
  0x3f   : > { %157 = sfence }
  0x40   : > { %v176_v0 = vld [vmem:[%s152_s26] sm:$0xff]  ;;  %v178_v1 = vld [vmem:[%s152_s26 + $0x10] sm:$0xff]  ;;  %v177_v2 = vld [vmem:[%s152_s26 + $0x8] sm:$0xff]  ;;  %s865_s20 = sld [smem:[#allocation2]]  ;;  %s888_s5 = scalar_lea.vmem [#allocation7], %s464_s14 }
  0x41   : > { %184 = vadd.xlane.f32.xlu0 %v176_v0  ;;  %188 = vadd.xlane.f32.xlu1 %v178_v1  ;;  %v179_v3 = vld [vmem:[%s152_s26 + $0x18] sm:$0xff]  ;;  %v180_v4 = vld [vmem:[%s152_s26 + $0x20] sm:$0xff]  ;;  %v181_v5 = vld [vmem:[%s152_s26 + $0x28] sm:$0xff]  ;;  %s466_s23 = sld [smem:[#allocation2 + $0x1]]  ;;  %s473_s7 = sshll.u32 %s719_s13, 10 }
  0x42   : > { %v182_v6 = vld [vmem:[%s152_s26 + $0x30] sm:$0xff]  ;;  %v183_v7 = vld [vmem:[%s152_s26 + $0x38] sm:$0xff]  ;;  %s370_s8 = sshll.u32 %s888_s5, 4  ;;  %s907_s25 = scalar_lea.hbm %s955_s2, %s473_s7  ;;  %s909_s8 = int_to_ptr.vmem [resolvable:$true] %s370_s8 }
  0x43   : > { %s357_s28 = scalar_lea.sflag [#allocation4], %s814_s6  ;;  %s606_s24 = scalar_lea.vmem %s909_s8, 1024 }
  0x44   : > { %p607_p12 = scmp.ne.s32.totalorder %s909_s8, %s606_s24  ;;  %p971_p13 = scmp.ne.s32.totalorder %s962_s21, 0 }
  0x45   : > { %186 = vadd.xlane.f32.xlu0 %v177_v2  ;;  %190 = vadd.xlane.f32.xlu1 %v179_v3  ;;  %s680_s13 = smov [#allocation7]  }
  0x46   : > { %p608_p7 = pnand %p607_p12, %p971_p13  ;;  %s610_s27 = sshll.u32 %s680_s13, 4  ;;  %s611_s27 = int_to_ptr.vmem [resolvable:$false] %s610_s27 }
  0x47   : > { %s612_s29 = scalar_lea.vmem %s611_s27, 2048  ;;  %p613_p9 = scmp.lt.s32.totalorder %s909_s8, %s611_s27 }
  0x48   : > { %p609_p8 = pneg %p608_p7  ;;  %p614_p10 = scmp.lt.s32.totalorder %s612_s29, %s606_s24 }
  0x49   : > { %192 = vadd.xlane.f32.xlu0 %v180_v4  ;;  %194 = vadd.xlane.f32.xlu1 %v181_v5 }
  0x4a   : > { %p615_p2 = por %p614_p10, %p613_p9 }
  0x4c   : > { %p616_p0 = pnand %p615_p2, %p609_p8 }
  0x4d   : > { %196 = vadd.xlane.f32.xlu0 %v182_v6  ;;  %198 = vadd.xlane.f32.xlu1 %v183_v7 }
  0xca   : > { %v185_v8 = vpop.xlane.xlu0 %184  ;;  %v189_v9 = vpop.xlane.xlu1 %188 }
  0xcb   : > { %v200_v10 = vmul.f32 0.0078125, %v185_v8  ;;  %v202_v11 = vmul.f32 0.0078125, %v189_v9 }
  0xcd   : > { %v824_v12 = vsub.f32 %v176_v0, %v200_v10  ;;  %v826_v13 = vsub.f32 %v178_v1, %v202_v11 }
  0xce   : > { %v187_v14 = vpop.xlane.xlu0 %186  ;;  %v191_v15 = vpop.xlane.xlu1 %190 }
  0xcf   : > { %v201_v16 = vmul.f32 0.0078125, %v187_v14  ;;  %v216_v17 = vmul.f32 %v824_v12, %v824_v12  ;;  %v203_v18 = vmul.f32 0.0078125, %v191_v15  ;;  %v218_v21 = vmul.f32 %v826_v13, %v826_v13 }
  0xd1   : > { %v830_v19 = vsub.f32 %v177_v2, %v201_v16  ;;  %224 = vadd.xlane.f32.xlu0 %v216_v17  ;;  %v832_v20 = vsub.f32 %v179_v3, %v203_v18 }
  0xd2   : > { %v193_v22 = vpop.xlane.xlu0 %192  ;;  %v195_v23 = vpop.xlane.xlu1 %194 }
  0xd3   : > { %v204_v24 = vmul.f32 0.0078125, %v193_v22  ;;  %v217_v25 = vmul.f32 %v830_v19, %v830_v19  ;;  %v205_v26 = vmul.f32 0.0078125, %v195_v23  ;;  %v219_v29 = vmul.f32 %v832_v20, %v832_v20 }
  0xd5   : > { %v838_v27 = vsub.f32 %v180_v4, %v204_v24  ;;  %228 = vadd.xlane.f32.xlu0 %v218_v21  ;;  %226 = vadd.xlane.f32.xlu1 %v217_v25  ;;  %v840_v28 = vsub.f32 %v181_v5, %v205_v26 }
  0xd6   : > { %v197_v30 = vpop.xlane.xlu0 %196  ;;  %v199_v31 = vpop.xlane.xlu1 %198 }
  0xd7   : > { %v206_v32 = vmul.f32 0.0078125, %v197_v30  ;;  %v220_v33 = vmul.f32 %v838_v27, %v838_v27  ;;  %v207_v34 = vmul.f32 0.0078125, %v199_v31  ;;  %v221_v37 = vmul.f32 %v840_v28, %v840_v28 }
  0xd9   : > { %v846_v35 = vsub.f32 %v182_v6, %v206_v32  ;;  %230 = vadd.xlane.f32.xlu1 %v219_v29  ;;  %232 = vadd.xlane.f32.xlu0 %v220_v33  ;;  %v848_v36 = vsub.f32 %v183_v7, %v207_v34 }
  0xdb   : > { %v222_v38 = vmul.f32 %v846_v35, %v846_v35  ;;  %v223_v39 = vmul.f32 %v848_v36, %v848_v36 }
  0xdd   : > { %234 = vadd.xlane.f32.xlu1 %v221_v37  ;;  %236 = vadd.xlane.f32.xlu0 %v222_v38 }
  0xe1   : > { %238 = vadd.xlane.f32.xlu1 %v223_v39 }
 0x15a   : > { %v225_v40 = vpop.xlane.xlu0 %224 }
 0x15b   : > { %v240_v41 = vmul.f32 0.007874016, %v225_v40 }
 0x15d   : > { %535 = vrsqrt.f32 %v240_v41  ;;  %vm250_vm0 = vcmp.eq.f32.partialorder %v240_v41, inf  ;;  %v253_v58 = vand.u32 2147483648, %v240_v41  ;;  %vm252_vm1 = vcmp.eq.f32.partialorder %v240_v41, 0.0 }
 0x15e   : > { %v227_v42 = vpop.xlane.xlu1 %226  ;;  %v229_v43 = vpop.xlane.xlu0 %228 }
 0x15f   : > { %v241_v44 = vmul.f32 0.007874016, %v227_v42  ;;  %v242_v45 = vmul.f32 0.007874016, %v229_v43 }
 0x161   : > { %537 = vrsqrt.f32 %v241_v44  ;;  %vm257_vm2 = vcmp.eq.f32.partialorder %v241_v44, inf  ;;  %vm259_vm3 = vcmp.eq.f32.partialorder %v241_v44, 0.0  ;;  %v260_v1 = vand.u32 2147483648, %v241_v44 }
 0x162   : > { %539 = vrsqrt.f32 %v242_v45  ;;  %v231_v46 = vpop.xlane.xlu1 %230  ;;  %v233_v47 = vpop.xlane.xlu0 %232  ;;  %vm264_vm4 = vcmp.eq.f32.partialorder %v242_v45, inf  ;;  %v267_v4 = vand.u32 2147483648, %v242_v45  ;;  %vm266_vm5 = vcmp.eq.f32.partialorder %v242_v45, 0.0 }
 0x163   : > { %v243_v48 = vmul.f32 0.007874016, %v231_v46  ;;  %v244_v49 = vmul.f32 0.007874016, %v233_v47  ;;  %v329_v47 = vstv %s865_s20 }
 0x165   : > { %541 = vrsqrt.f32 %v243_v48  ;;  %vm271_vm6 = vcmp.eq.f32.partialorder %v243_v48, inf  ;;  %vm273_vm7 = vcmp.eq.f32.partialorder %v243_v48, 0.0  ;;  %v274_v15 = vand.u32 2147483648, %v243_v48 }
 0x166   : > { %543 = vrsqrt.f32 %v244_v49  ;;  %v235_v50 = vpop.xlane.xlu1 %234  ;;  %v237_v51 = vpop.xlane.xlu0 %236  ;;  %vm278_vm8 = vcmp.eq.f32.partialorder %v244_v49, inf  ;;  %v281_v18 = vand.u32 2147483648, %v244_v49  ;;  %vm280_vm9 = vcmp.eq.f32.partialorder %v244_v49, 0.0 }
 0x167   : > { %v856_v52 = vmul.f32 0.007874016, %v235_v50  ;;  %v858_v53 = vmul.f32 0.007874016, %v237_v51  ;;  %v339_v51 = vstv %s466_s23 }
 0x169   : > { %545 = vrsqrt.f32 %v856_v52  ;;  %vm285_vm10 = vcmp.eq.f32.partialorder %v856_v52, inf  ;;  %vm287_vm11 = vcmp.eq.f32.partialorder %v856_v52, 0.0  ;;  %v288_v31 = vand.u32 2147483648, %v856_v52 }
 0x16a   : > { %v536_v54 = vpop.eup %535  ;;  %547 = vrsqrt.f32 %v858_v53  ;;  %v239_v55 = vpop.xlane.xlu1 %238  ;;  %vm292_vm12 = vcmp.eq.f32.partialorder %v858_v53, inf  ;;  %v295_v34 = vand.u32 2147483648, %v858_v53  ;;  %vm294_vm13 = vcmp.eq.f32.partialorder %v858_v53, 0.0 }
 0x16b   : > { %v249_v56 = vmul.f32 %v536_v54, %v240_v41  ;;  %v862_v57 = vmul.f32 0.007874016, %v239_v55 }
 0x16d   : > { %v251_v59 = vsel %vm250_vm0, %v240_v41, %v249_v56  ;;  %549 = vrsqrt.f32 %v862_v57  ;;  %vm299_vm14 = vcmp.eq.f32.partialorder %v862_v57, inf  ;;  %vm301_vm15 = vcmp.eq.f32.partialorder %v862_v57, 0.0 }
 0x16e   : > { %v538_v60 = vpop.eup %537  ;;  %v254_v61 = vsel %vm252_vm1, %v253_v58, %v251_v59 }
 0x16f   : > { %v540_v62 = vpop.eup %539  ;;  %v304_v63 = vadd.f32 1e-12, %v254_v61  ;;  %v256_v0 = vmul.f32 %v538_v60, %v241_v44 }
 0x170   : > { %v263_v2 = vmul.f32 %v540_v62, %v242_v45 }
 0x171   : > { %551 = vrcp.f32 %v304_v63  ;;  %v258_v3 = vsel %vm257_vm2, %v241_v44, %v256_v0  ;;  %v302_v44 = vand.u32 2147483648, %v862_v57 }
 0x172   : > { %v542_v5 = vpop.eup %541  ;;  %v261_v6 = vsel %vm259_vm3, %v260_v1, %v258_v3  ;;  %v265_v7 = vsel %vm264_vm4, %v242_v45, %v263_v2 }
 0x173   : > { %v544_v8 = vpop.eup %543  ;;  %v305_v9 = vadd.f32 1e-12, %v261_v6  ;;  %v268_v10 = vsel %vm266_vm5, %v267_v4, %v265_v7  ;;  %v270_v11 = vmul.f32 %v542_v5, %v243_v48 }
 0x174   : > { %v306_v14 = vadd.f32 1e-12, %v268_v10  ;;  %v277_v16 = vmul.f32 %v544_v8, %v244_v49 }
 0x175   : > { %553 = vrcp.f32 %v305_v9  ;;  %v272_v17 = vsel %vm271_vm6, %v243_v48, %v270_v11 }
 0x176   : > { %v546_v21 = vpop.eup %545  ;;  %555 = vrcp.f32 %v306_v14  ;;  %v275_v22 = vsel %vm273_vm7, %v274_v15, %v272_v17  ;;  %v279_v23 = vsel %vm278_vm8, %v244_v49, %v277_v16 }
 0x177   : > { %v548_v24 = vpop.eup %547  ;;  %v307_v25 = vadd.f32 1e-12, %v275_v22  ;;  %v282_v26 = vsel %vm280_vm9, %v281_v18, %v279_v23  ;;  %v284_v29 = vmul.f32 %v546_v21, %v856_v52 }
 0x178   : > { %v308_v30 = vadd.f32 1e-12, %v282_v26  ;;  %v291_v32 = vmul.f32 %v548_v24, %v858_v53 }
 0x179   : > { %557 = vrcp.f32 %v307_v25  ;;  %v286_v33 = vsel %vm285_vm10, %v856_v52, %v284_v29 }
 0x17a   : > { %v550_v37 = vpop.eup %549  ;;  %559 = vrcp.f32 %v308_v30  ;;  %v289_v38 = vsel %vm287_vm11, %v288_v31, %v286_v33  ;;  %v293_v39 = vsel %vm292_vm12, %v858_v53, %v291_v32 }
 0x17b   : > { %v309_v40 = vadd.f32 1e-12, %v289_v38  ;;  %v296_v41 = vsel %vm294_vm13, %v295_v34, %v293_v39  ;;  %v298_v42 = vmul.f32 %v550_v37, %v862_v57 }
 0x17c   : > { %v310_v43 = vadd.f32 1e-12, %v296_v41 }
 0x17d   : > { %561 = vrcp.f32 %v309_v40  ;;  %v300_v45 = vsel %vm299_vm14, %v862_v57, %v298_v42 }
 0x17e   : > { %v552_v46 = vpop.eup %551  ;;  %563 = vrcp.f32 %v310_v43  ;;  %v303_v48 = vsel %vm301_vm15, %v302_v44, %v300_v45 }
 0x17f   : > { %v321_v49 = vmul.f32 %v552_v46, %v824_v12  ;;  %v311_v50 = vadd.f32 1e-12, %v303_v48 }
 0x181   : > { %v330_v52 = vmul.f32 %v329_v47, %v321_v49  ;;  %565 = vrcp.f32 %v311_v50 }
 0x182   : > { %v554_v53 = vpop.eup %553 }
 0x183   : > { %v556_v54 = vpop.eup %555  ;;  %v340_v55 = vadd.f32 %v339_v51, %v330_v52  ;;  %v322_v56 = vmul.f32 %v554_v53, %v830_v19 }
 0x184   : > { %v323_v58 = vmul.f32 %v556_v54, %v826_v13 }
 0x185   : > { %348 = vst [vmem:[%s888_s5] sm:$0xff] %v340_v55  ;;  %v331_v57 = vmul.f32 %v329_v47, %v322_v56 }
 0x186   : > { %v558_v12 = vpop.eup %557  ;;  %v332_v59 = vmul.f32 %v329_v47, %v323_v58 }
 0x187   : > { %v560_v60 = vpop.eup %559  ;;  %v341_v61 = vadd.f32 %v339_v51, %v331_v57  ;;  %v324_v62 = vmul.f32 %v558_v12, %v832_v20 }
 0x188   : > { %v342_v63 = vadd.f32 %v339_v51, %v332_v59  ;;  %v325_v19 = vmul.f32 %v560_v60, %v838_v27 }
 0x189   : > { %349 = vst [vmem:[%s888_s5 + $0x8] sm:$0xff] %v341_v61  ;;  %v333_v13 = vmul.f32 %v329_v47, %v324_v62 }
 0x18a   : > { %v562_v0 = vpop.eup %561  ;;  %350 = vst [vmem:[%s888_s5 + $0x10] sm:$0xff] %v342_v63  ;;  %v334_v1 = vmul.f32 %v329_v47, %v325_v19 }
 0x18b   : > { %v564_v2 = vpop.eup %563  ;;  %v343_v3 = vadd.f32 %v339_v51, %v333_v13  ;;  %v326_v4 = vmul.f32 %v562_v0, %v840_v28 }
 0x18c   : > { %v344_v5 = vadd.f32 %v339_v51, %v334_v1  ;;  %v327_v20 = vmul.f32 %v564_v2, %v846_v35 }
 0x18d   : > { %351 = vst [vmem:[%s888_s5 + $0x18] sm:$0xff] %v343_v3  ;;  %v335_v6 = vmul.f32 %v329_v47, %v326_v4 }
 0x18e   : > { %v566_v27 = vpop.eup %565  ;;  %352 = vst [vmem:[%s888_s5 + $0x20] sm:$0xff] %v344_v5  ;;  %v336_v7 = vmul.f32 %v329_v47, %v327_v20 }
 0x18f   : > { %v345_v8 = vadd.f32 %v339_v51, %v335_v6  ;;  %v328_v9 = vmul.f32 %v566_v27, %v848_v36 }
 0x190   : > { %v346_v10 = vadd.f32 %v339_v51, %v336_v7 }
 0x191   : > { %353 = vst [vmem:[%s888_s5 + $0x28] sm:$0xff] %v345_v8  ;;  %v337_v11 = vmul.f32 %v329_v47, %v328_v9 }
 0x192   : > { %354 = vst [vmem:[%s888_s5 + $0x30] sm:$0xff] %v346_v10 }
 0x193   : > { %v347_v28 = vadd.f32 %v339_v51, %v337_v11 }
 0x195   : > { %355 = vst [vmem:[%s888_s5 + $0x38] sm:$0xff] %v347_v28 }
 0x196   : > { %619 = shalt.err (!%p616_p0)
}
 0x197   : > { %s620_s30 = scalar_lea.hbm %s907_s25, 1024  ;;  %s624_s14 = scalar_lea.hbm %s955_s2, 2048 }
 0x198   : > { %p621_p3 = scmp.ne.s32.totalorder %s907_s25, %s620_s30  ;;  %p625_p1 = scmp.lt.s32.totalorder %s907_s25, %s955_s2 }
 0x199   : > { %p626_p6 = scmp.lt.s32.totalorder %s624_s14, %s620_s30 }
 0x19a   : > { %p622_p5 = pnand %p621_p3, %p971_p13 }
 0x19b   : > { %p627_p11 = por %p626_p6, %p625_p1 }
 0x19c   : > { %p623_p4 = pneg %p622_p5 }
 0x19e   : > { %p628_p12 = pnand %p627_p11, %p623_p4 }
 0x1a0   : > { %631 = shalt.err (!%p628_p12)
}
 0x1a1   : > { %s681_s20 = smov 128   ;;  %s682_s23 = smov 8  }
 0x1a2   : > { %480 = dma.vmem_to_hbm [thread:$0]  (%p971_p13), %s909_s8, 1024, %s907_s25, %s357_s28, %s681_s20, %s681_s20, %s682_s23  }
 0x1a3 PF: > { %s385_s5 = sand.u32 1, %s662_s9   ;;  %p972_p7 = scmp.ne.s32.totalorder %s963_s22, 0 }
 0x1a4   : > { %p973_p8 = scmp.ge.s32.totalorder %s674_s12, 2  ;;  %s386_s7 = scalar_lea.sflag [#allocation4], %s385_s5 }
 0x1a6   : > { %p491_p9 = pnand %p973_p8, %p972_p7 }
 0x1a8   : > { %p492_p10 = pneg %p491_p9 }
 0x1aa   : > { %657 = dma.done.wait (%p492_p10), %s386_s7, 1024  }
 0x1ab   : > { %659 = vsyncadd (%p492_p10), %s386_s7, 4294966272  ;;  %p16_p2 = scmp.ge.s32.totalorder %s723_s15, 4   ;;  %s974_s9 = smov %s666_s10 }
 0x1ac   : > { %s975_s10 = smov %s670_s11  ;;  %s976_s11 = smov %s735_s18 }
 0x1ad   : > { %s977_s12 = smov %s723_s15  ;;  %18 = sbr.rel (!%p16_p2) target bundleno = 6 (0x6), region = 78 }
 0x1b2   :  { %391 = vsyncpa [#allocation3], 1 }
 0x1b3   :  { %393 = vsyncpa [#allocation3 + $0x1], 1 }
 0x1b4   :  { %394 = vsyncpa [#allocation4], 1 }
 0x1b5   :  { %396 = vsyncpa [#allocation4 + $0x1], 1 }
 0x1b6   :  { %397 = vsyncpa [#allocation5], 1 }
 0x1b7   :  { %399 = vsyncpa [#allocation5 + $0x1], 1 }

</bundles_post_ra>
